<compile_context>
chip_gen: v5e
topology: v5e:2x2
jax: 0.10.0
libtpu: 0.0.40
codegen_flags: <defaults>
</compile_context>

<pallas_src>
import functools
import math

import jax
import jax.numpy as jnp
from jax.experimental import pallas as pl
from jax.experimental.pallas import tpu as pltpu

LANES = 128
_P1 = 1.0 / (1.0 + math.exp(-1.0))                      # sigma(+1)
_P0 = 1.0 - _P1                                         # sigma(-1)
_CONST_ENT = _P1 * math.log(_P1) + _P0 * math.log(_P0)  # sum_c q*log(q) per row


def _round_up(x, m):
    return ((x + m - 1) // m) * m


def _cdiv(a, b):
    return -(-a // b)


def _num_tensorcores():
    """2 TensorCores per chip only on v7x-class parts; v5e/v6e have one."""
    try:
        kind = jax.devices()[0].device_kind.lower()
    except Exception:
        return 1
    return 2 if ("v7" in kind or "7x" in kind) else 1


def _ce_rdrop_kernel(d_ref, code_ref, out_ref, *, c_kl):
    """One (tile_r, 128) slab: accumulate (1+c_kl)*softplus(d) - w*d into the
    per-core (8, 128) output block (VMEM-resident across the reduction axis)."""
    i = pl.program_id(1)

    @pl.when(i == 0)
    def _():
        out_ref[...] = jnp.zeros_like(out_ref)

    d = d_ref[...]                                 # f32 (tile_r, 128)
    code = code_ref[...].astype(jnp.int32)         # int8 -> int32; -1 marks padding
    valid = code >= 0
    t = (code & 1).astype(jnp.float32)             # own target bit
    tp = ((code >> 1) & 1).astype(jnp.float32)     # R-Drop partner's target bit

    # Numerically stable softplus(d) = max(d, 0) + log1p(exp(-|d|)).
    sp = jnp.maximum(d, 0.0) + jnp.log1p(jnp.exp(-jnp.abs(d)))
    w = t + c_kl * (_P0 + (_P1 - _P0) * tp)        # 4 distinct values, exact f32
    contrib = jnp.where(valid, (1.0 + c_kl) * sp - w * d, 0.0)

    # Fold the (tile_r, 128) slab into a single (8, 128) vreg of partial sums.
    out_ref[...] += jnp.sum(contrib.reshape(d.shape[0] // 8, 8, LANES), axis=0)


@functools.partial(jax.jit, static_argnames=("alpha", "tile_rows", "n_cores"))
def ce_with_rdrop(inputs, targets, alpha=2.5, *, tile_rows=2048, n_cores=None):
    """inputs: (N, 2) float logits, targets: (N,) int class ids, N even."""
    n, c = inputs.shape
    assert c == 2 and n % 2 == 0
    if n_cores is None:
        n_cores = _num_tensorcores()
    c_kl = float(alpha) / 4.0

    # Lane-dense prep (cheap; fuses under this jit / an upstream producer):
    #   d    : logit difference, in f32 (avoids bf16 cancellation pre-kernel)
    #   code : 2-bit (t, t_partner) packed into a single int8 stream.
    x = inputs.astype(jnp.float32)
    d = x[:, 1] - x[:, 0]
    t = targets.astype(jnp.int32)
    tp = t.reshape(n // 2, 2)[:, ::-1].reshape(-1)    # target of R-Drop twin (i ^ 1)
    code = (t + 2 * tp).astype(jnp.int8)

    rows = _cdiv(n, LANES)
    # int8 min tile is (32, 128) -> tile_r must be a multiple of 32.
    tile_r = min(_round_up(max(int(tile_rows), 32), 32),
                 _round_up(_cdiv(rows, n_cores), 32))
    tiles_per_core = _cdiv(rows, n_cores * tile_r)
    padded_rows = n_cores * tiles_per_core * tile_r
    pad = padded_rows * LANES - n
    if pad:
        d = jnp.pad(d, (0, pad))                             # sp(0) is masked anyway
        code = jnp.pad(code, (0, pad), constant_values=-1)   # -1 => masked out
    d2 = d.reshape(padded_rows, LANES)
    code2 = code.reshape(padded_rows, LANES)

    row_map = lambda c_, i_: (c_ * tiles_per_core + i_, 0)
    kernel = functools.partial(_ce_rdrop_kernel, c_kl=c_kl)

    partials = pl.pallas_call(
        kernel,
        out_shape=jax.ShapeDtypeStruct((n_cores * 8, LANES), jnp.float32),
        grid_spec=pltpu.PrefetchScalarGridSpec(
            num_scalar_prefetch=0,
            grid=(n_cores, tiles_per_core),
            in_specs=[
                pl.BlockSpec((tile_r, LANES), row_map),   # d   : f32, 4 B/sample
                pl.BlockSpec((tile_r, LANES), row_map),   # code: int8, 1 B/sample
            ],
            out_specs=pl.BlockSpec((8, LANES), lambda c_, i_: (c_, 0)),
        ),
        compiler_params=pltpu.CompilerParams(
            dimension_semantics=("parallel", "arbitrary"),
            vmem_limit_bytes=32 * 1024 * 1024,
        ),
    )(d2, code2)

    # Tiny (n_cores*8*128) cross-lane/core combine + per-row constant + 1/N.
    return jnp.sum(partials) / jnp.float32(n) + jnp.float32(c_kl * _CONST_ENT)


def _ref_loss(inputs, targets, alpha):
    """Pure-JAX reference of the PyTorch forward."""
    logp = jax.nn.log_softmax(inputs.astype(jnp.float32), axis=1)
    ce = -jnp.mean(jnp.take_along_axis(logp, targets[:, None], axis=1))
    oh = jnp.eye(2, dtype=jnp.float32)[targets]
    soft = jax.nn.softmax(oh, axis=1)
    kl1 = jnp.mean(soft[1::2] * (jnp.log(soft[1::2]) - logp[0::2]))
    kl2 = jnp.mean(soft[0::2] * (jnp.log(soft[0::2]) - logp[1::2]))
    return ce + (kl1 + kl2) / 4.0 * alpha


if __name__ == "__main__":
    key = jax.random.PRNGKey(0)
    k1, k2, k3, k4 = jax.random.split(key, 4)

    # Small pair-structured batch (even/odd rows are the two R-Drop passes).
    N = 8
    inputs = jax.random.normal(k1, (N, 2), dtype=jnp.float32)
    targets = jax.random.randint(k2, (N,), 0, 2, dtype=jnp.int32)
    loss = jax.block_until_ready(ce_with_rdrop(inputs, targets, alpha=2.5))
    ref = _ref_loss(inputs, targets, 2.5)
    assert jnp.allclose(loss, ref, atol=1e-5, rtol=1e-4), (loss, ref)

    # Larger case exercising padding, multi-tile accumulation per core and the
    # two-core "parallel" grid axis with tiny forced tiles.
    N2 = 12000
    inputs2 = jax.random.normal(k3, (N2, 2), dtype=jnp.float32)
    targets2 = jax.random.randint(k4, (N2,), 0, 2, dtype=jnp.int32)
    ref2 = _ref_loss(inputs2, targets2, 2.5)
    loss2 = jax.block_until_ready(
        ce_with_rdrop(inputs2, targets2, alpha=2.5, tile_rows=32, n_cores=2))
    assert jnp.allclose(loss2, ref2, atol=1e-5, rtol=1e-4), (loss2, ref2)

    # Default (large-tile, auto core-count) configuration.
    loss3 = jax.block_until_ready(ce_with_rdrop(inputs2, targets2, alpha=2.5))
    assert jnp.allclose(loss3, ref2, atol=1e-5, rtol=1e-4), (loss3, ref2)

    print("KERNEL_OK")
</pallas_src>

<mosaic_0001>
module attributes {stable_mosaic.version = 11 : i64} {
  func.func @_ce_rdrop_kernel(%arg0: i32, %arg1: i32, %arg2: memref<32x128xf32, #tpu.memory_space<vmem>>, %arg3: memref<32x128xi8, #tpu.memory_space<vmem>>, %arg4: memref<8x128xf32, #tpu.memory_space<vmem>>) attributes {dimension_semantics = [#tpu.dimension_semantics<parallel>, #tpu.dimension_semantics<arbitrary>], iteration_bounds = array<i64: 1, 1>, scalar_prefetch = 0 : i64, scratch_operands = 0 : i64, tpu.core_type = #tpu.core_type<tc>, window_params = [{transform_indices = @transform_0, window_bounds = array<i64: 32, 128>}, {transform_indices = @transform_1, window_bounds = array<i64: 32, 128>}, {transform_indices = @transform_2, window_bounds = array<i64: 8, 128>}]} {
    %c0_i32 = arith.constant 0 : i32
    %0 = arith.cmpi eq, %arg1, %c0_i32 : i32
    %1 = arith.extui %0 : i1 to i32
    %c0_i32_0 = arith.constant 0 : i32
    %2 = arith.cmpi ne, %1, %c0_i32_0 : i32
    scf.if %2 {
      %cst_18 = arith.constant 0.000000e+00 : f32
      %42 = vector.broadcast %cst_18 : f32 to vector<8x128xf32>
      %c0_19 = arith.constant 0 : index
      %c0_20 = arith.constant 0 : index
      %43 = vector.load %arg4[%c0_19, %c0_20] : memref<8x128xf32, #tpu.memory_space<vmem>>, vector<8x128xf32>
      tpu.vector_store %arg4[%c0_19, %c0_20], %42 {strides = array<i32>} : memref<8x128xf32, #tpu.memory_space<vmem>>, vector<8x128xf32>,
    } else {
    }
    %c0 = arith.constant 0 : index
    %c0_1 = arith.constant 0 : index
    %3 = vector.load %arg2[%c0, %c0_1] : memref<32x128xf32, #tpu.memory_space<vmem>>, vector<32x128xf32>
    %c0_2 = arith.constant 0 : index
    %c0_3 = arith.constant 0 : index
    %4 = vector.load %arg3[%c0_2, %c0_3] : memref<32x128xi8, #tpu.memory_space<vmem>>, vector<32x128xi8>
    %5 = arith.extsi %4 : vector<32x128xi8> to vector<32x128xi32>
    %c0_i32_4 = arith.constant 0 : i32
    %6 = vector.broadcast %c0_i32_4 : i32 to vector<32x128xi32>
    %7 = arith.cmpi sge, %5, %6 : vector<32x128xi32>
    %c1_i32 = arith.constant 1 : i32
    %8 = vector.broadcast %c1_i32 : i32 to vector<32x128xi32>
    %9 = arith.andi %5, %8 : vector<32x128xi32>
    %10 = arith.sitofp %9 : vector<32x128xi32> to vector<32x128xf32>
    %c1_i32_5 = arith.constant 1 : i32
    %11 = vector.broadcast %c1_i32_5 : i32 to vector<32x128xi32>
    %12 = arith.shrsi %5, %11 : vector<32x128xi32>
    %c1_i32_6 = arith.constant 1 : i32
    %13 = vector.broadcast %c1_i32_6 : i32 to vector<32x128xi32>
    %14 = arith.andi %12, %13 : vector<32x128xi32>
    %15 = arith.sitofp %14 : vector<32x128xi32> to vector<32x128xf32>
    %cst = arith.constant 0.000000e+00 : f32
    %16 = vector.broadcast %cst : f32 to vector<32x128xf32>
    %17 = arith.maximumf %3, %16 : vector<32x128xf32>
    %18 = math.absf %3 : vector<32x128xf32>
    %cst_7 = arith.constant 0.000000e+00 : f32
    %19 = vector.broadcast %cst_7 : f32 to vector<32x128xf32>
    %20 = arith.subf %19, %18 : vector<32x128xf32>
    %21 = math.exp %20 : vector<32x128xf32>
    %22 = math.log1p %21 : vector<32x128xf32>
    %23 = arith.addf %17, %22 : vector<32x128xf32>
    %cst_8 = arith.constant 0.462117165 : f32
    %24 = vector.broadcast %cst_8 : f32 to vector<32x128xf32>
    %25 = arith.mulf %24, %15 : vector<32x128xf32>
    %cst_9 = arith.constant 0.268941432 : f32
    %26 = vector.broadcast %cst_9 : f32 to vector<32x128xf32>
    %27 = arith.addf %26, %25 : vector<32x128xf32>
    %cst_10 = arith.constant 6.250000e-01 : f32
    %28 = vector.broadcast %cst_10 : f32 to vector<32x128xf32>
    %29 = arith.mulf %28, %27 : vector<32x128xf32>
    %30 = arith.addf %10, %29 : vector<32x128xf32>
    %cst_11 = arith.constant 1.625000e+00 : f32
    %31 = vector.broadcast %cst_11 : f32 to vector<32x128xf32>
    %32 = arith.mulf %31, %23 : vector<32x128xf32>
    %33 = arith.mulf %30, %3 : vector<32x128xf32>
    %34 = arith.subf %32, %33 : vector<32x128xf32>
    %cst_12 = arith.constant 0.000000e+00 : f32
    %35 = vector.broadcast %cst_12 : f32 to vector<32x128xf32>
    %36 = arith.select %7, %34, %35 : vector<32x128xi1>, vector<32x128xf32>
    %c0_13 = arith.constant 0 : index
    %c0_14 = arith.constant 0 : index
    %37 = vector.load %arg4[%c0_13, %c0_14] : memref<8x128xf32, #tpu.memory_space<vmem>>, vector<8x128xf32>
    %38 = vector.shape_cast %36 : vector<32x128xf32> to vector<4x8x128xf32>
    %cst_15 = arith.constant dense<0.000000e+00> : vector<8x128xf32>
    %39 = vector.multi_reduction <add>, %38, %cst_15 [0] : vector<4x8x128xf32> to vector<8x128xf32>
    %40 = arith.addf %37, %39 : vector<8x128xf32>
    %c0_16 = arith.constant 0 : index
    %c0_17 = arith.constant 0 : index
    %41 = vector.load %arg4[%c0_16, %c0_17] : memref<8x128xf32, #tpu.memory_space<vmem>>, vector<8x128xf32>
    tpu.vector_store %arg4[%c0_16, %c0_17], %40 {strides = array<i32>} : memref<8x128xf32, #tpu.memory_space<vmem>>, vector<8x128xf32>,
    return
  }
  func.func @transform_0(%arg0: i32, %arg1: i32) -> (i32, i32) {
    %c1_i32 = arith.constant 1 : i32
    %0 = arith.muli %arg0, %c1_i32 : i32
    %1 = arith.addi %0, %arg1 : i32
    %c0_i32 = arith.constant 0 : i32
    %c0_i32_0 = arith.constant 0 : i32
    return %1, %c0_i32 : i32, i32
  }
  func.func @transform_1(%arg0: i32, %arg1: i32) -> (i32, i32) {
    %c1_i32 = arith.constant 1 : i32
    %0 = arith.muli %arg0, %c1_i32 : i32
    %1 = arith.addi %0, %arg1 : i32
    %c0_i32 = arith.constant 0 : i32
    %c0_i32_0 = arith.constant 0 : i32
    return %1, %c0_i32 : i32, i32
  }
  func.func @transform_2(%arg0: i32, %arg1: i32) -> (i32, i32) {
    %c0_i32 = arith.constant 0 : i32
    %c0_i32_0 = arith.constant 0 : i32
    return %arg0, %c0_i32 : i32, i32
  }
}

</mosaic_0001>

<bundles_post_ra>
// kernel: ce_with_rdrop.1
= control target key start
LH: loop header
LB: loop body
LE: loop exit
PB: predicated region body
PF: predicated region fallthrough
CT: control target
= control target key end

     0   :  { %s310_s0 = inlined_call_operand.vmem [shape: f32[32,128], index: 0, kind: input, shape index: {}]   ;;  %s311_s1 = inlined_call_operand.vmem [shape: s8[32,128], index: 1, kind: input, shape index: {}]   ;;  %s312_s2 = inlined_call_operand.vmem [shape: f32[8,128], index: 2, kind: output, shape index: {}]  }
   0x1   :  { %v59_v0 = vld [vmem:[%s311_s1] sm:$0xff]  ;;  %v245_v2 = vld [vmem:[%s310_s0 + $0x8] sm:$0xff]  ;;  %v260_v9 = vld [vmem:[%s310_s0 + $0x10] sm:$0xff] }
   0x2   :  { %v240_v1 = vld [vmem:[%s310_s0] sm:$0xff]  ;;  %v247_v3 = vunpack.c.0.s8 %v59_v0  ;;  %v249_v4 = vunpack.c.1.s8 %v59_v0  ;;  %v251_v5 = vunpack.c.2.s8 %v59_v0  ;;  %v253_v6 = vunpack.c.3.s8 %v59_v0  ;;  %v265_v10 = vld [vmem:[%s310_s0 + $0x18] sm:$0xff] }
   0x3   :  { %v92_v7 = vand.u32 2147483647, %v240_v1  ;;  %v93_v8 = vand.u32 2147483647, %v245_v2  ;;  %v94_v17 = vand.u32 2147483647, %v260_v9 }
   0x4   :  { %v76_v11 = vshra.s32 %v247_v3, 1  ;;  %v77_v12 = vshra.s32 %v249_v4, 1  ;;  %v78_v13 = vshra.s32 %v251_v5, 1  ;;  %v79_v14 = vshra.s32 %v253_v6, 1 }
   0x5   :  { %v95_v18 = vand.u32 2147483647, %v265_v10  ;;  %v96_v19 = vsub.f32 0.0, %v92_v7  ;;  %v97_v20 = vsub.f32 0.0, %v93_v8  ;;  %v98_v24 = vsub.f32 0.0, %v94_v17 }
   0x6   :  { %v80_v15 = vand.u32 1, %v76_v11  ;;  %v81_v16 = vand.u32 1, %v77_v12  ;;  %v82_v21 = vand.u32 1, %v78_v13  ;;  %v83_v22 = vand.u32 1, %v79_v14 }
   0x7   :  { %v99_v25 = vsub.f32 0.0, %v95_v18  ;;  %v100_v26 = vmul.f32 1.442695, %v96_v19  ;;  %v102_v27 = vmul.f32 1.442695, %v97_v20  ;;  %v68_v34 = vand.u32 1, %v247_v3 }
   0x8   :  { %v84_v23 = vcvt.s32.f32 %v80_v15  ;;  %v85_v28 = vcvt.s32.f32 %v81_v16  ;;  %v104_v29 = vmul.f32 1.442695, %v98_v24  ;;  %v86_v31 = vcvt.s32.f32 %v82_v21 }
   0x9   :  { %203 = vpow2.f32 %v100_v26  ;;  %v106_v30 = vmul.f32 1.442695, %v99_v25  ;;  %v87_v32 = vcvt.s32.f32 %v83_v22  ;;  %v69_v35 = vand.u32 1, %v249_v4 }
   0xa   :  { %205 = vpow2.f32 %v102_v27  ;;  %v148_v33 = vmul.f32 0.46211717, %v84_v23  ;;  %v149_v36 = vmul.f32 0.46211717, %v85_v28  ;;  %v88_v37 = vmax.f32 %v240_v1, 0.0 }
   0xb   :  { %207 = vpow2.f32 %v104_v29  ;;  %v150_v38 = vmul.f32 0.46211717, %v86_v31  ;;  %v151_v39 = vmul.f32 0.46211717, %v87_v32  ;;  %v70_v41 = vand.u32 1, %v251_v5 }
   0xc   :  { %209 = vpow2.f32 %v106_v30  ;;  %v89_v42 = vmax.f32 %v245_v2, 0.0  ;;  %v90_v43 = vmax.f32 %v260_v9, 0.0  ;;  %v152_v44 = vadd.f32 0.26894143, %v148_v33 }
   0xd   :  { %v71_v46 = vand.u32 1, %v253_v6  ;;  %v72_v47 = vcvt.s32.f32 %v68_v34  ;;  %v73_v51 = vcvt.s32.f32 %v69_v35  ;;  %v153_v54 = vadd.f32 0.26894143, %v149_v36 }
   0xe   :  { %v154_v57 = vadd.f32 0.26894143, %v150_v38  ;;  %v155_v58 = vadd.f32 0.26894143, %v151_v39  ;;  %v156_v61 = vmul.f32 0.625, %v152_v44  ;;  %v74_v13 = vcvt.s32.f32 %v70_v41 }
   0xf   :  { %v204_v40 = vpop.eup %203  ;;  %v157_v12 = vmul.f32 0.625, %v153_v54  ;;  %v75_v16 = vcvt.s32.f32 %v71_v46  ;;  %v91_v31 = vmax.f32 %v265_v10, 0.0  ;;  %vm64_vm4 = vcmp.ge.s32.totalorder %v247_v3, 0 }
  0x10   :  { %v206_v45 = vpop.eup %205  ;;  %v108_v48 = vadd.f32 1.0, %v204_v40  ;;  %v111_v49 = vmul.f32 -0.5, %v204_v40  ;;  %v114_v62 = vand.u32 2147483647, %v204_v40  ;;  %v158_v15 = vmul.f32 0.625, %v154_v57 }
  0x11   :  { %v208_v50 = vpop.eup %207  ;;  %v117_v52 = vadd.f32 1.0, %v206_v45  ;;  %v120_v53 = vmul.f32 -0.5, %v206_v45  ;;  %v123_v7 = vand.u32 2147483647, %v206_v45  ;;  %v159_v19 = vmul.f32 0.625, %v155_v58 }
  0x12   :  { %v210_v55 = vpop.eup %209  ;;  %211 = vlog2.f32 %v108_v48  ;;  %v126_v56 = vadd.f32 1.0, %v208_v50  ;;  %v112_v59 = vadd.f32 1.0, %v111_v49  ;;  %v129_v60 = vmul.f32 -0.5, %v208_v50 }
  0x13   :  { %213 = vlog2.f32 %v117_v52  ;;  %v121_v63 = vadd.f32 1.0, %v120_v53  ;;  %v135_v0 = vadd.f32 1.0, %v210_v55  ;;  %v138_v11 = vmul.f32 -0.5, %v210_v55 }
  0x14   :  { %215 = vlog2.f32 %v126_v56  ;;  %v130_v8 = vadd.f32 1.0, %v129_v60  ;;  %v132_v14 = vand.u32 2147483647, %v208_v50  ;;  %v113_v17 = vmul.f32 %v204_v40, %v112_v59 }
  0x15   :  { %217 = vlog2.f32 %v135_v0  ;;  %v139_v18 = vadd.f32 1.0, %v138_v11  ;;  %vm280_vm0 = vcmp.lt.f32.partialorder %v114_v62, 0.0004427343  ;;  %v122_v22 = vmul.f32 %v206_v45, %v121_v63 }
  0x16   :  { %v141_v23 = vand.u32 2147483647, %v210_v55  ;;  %v160_v24 = vadd.f32 %v156_v61, %v72_v47  ;;  %vm284_vm1 = vcmp.lt.f32.partialorder %v123_v7, 0.0004427343  ;;  %v131_v28 = vmul.f32 %v208_v50, %v130_v8 }
  0x17   :  { %v161_v29 = vadd.f32 %v157_v12, %v73_v51  ;;  %vm133_vm2 = vcmp.lt.f32.partialorder %v132_v14, 0.0004427343  ;;  %v162_v33 = vadd.f32 %v158_v15, %v74_v13  ;;  %v140_v36 = vmul.f32 %v210_v55, %v139_v18 }
  0x18   :  { %v212_v20 = vpop.eup %211  ;;  %v163_v38 = vadd.f32 %v159_v19, %v75_v16  ;;  %vm142_vm3 = vcmp.lt.f32.partialorder %v141_v23, 0.0004427343  ;;  %v168_v44 = vmul.f32 %v160_v24, %v240_v1  ;;  %vm65_vm5 = vcmp.ge.s32.totalorder %v249_v4, 0 }
  0x19   :  { %v214_v25 = vpop.eup %213  ;;  %v110_v26 = vmul.f32 0.6931472, %v212_v20  ;;  %v169_v48 = vmul.f32 %v161_v29, %v245_v2  ;;  %v170_v51 = vmul.f32 %v162_v33, %v260_v9  ;;  %vm66_vm6 = vcmp.ge.s32.totalorder %v251_v5, 0 }
  0x1a   :  { %v216_v30 = vpop.eup %215  ;;  %v119_v32 = vmul.f32 0.6931472, %v214_v25  ;;  %v171_v54 = vmul.f32 %v163_v38, %v265_v10  ;;  %vm67_vm7 = vcmp.ge.s32.totalorder %v253_v6, 0 }
  0x1b   :  { %v116_v34 = vsel %vm280_vm0, %v113_v17, %v110_v26  ;;  %v128_v35 = vmul.f32 0.6931472, %v216_v30  ;;  %v218_v39 = vpop.eup %217 }
  0x1c   :  { %v125_v40 = vsel %vm284_vm1, %v122_v22, %v119_v32  ;;  %v144_v41 = vadd.f32 %v116_v34, %v88_v37  ;;  %v137_v46 = vmul.f32 0.6931472, %v218_v39 }
  0x1d   :  { %v134_v45 = vsel %vm133_vm2, %v131_v28, %v128_v35  ;;  %v145_v47 = vadd.f32 %v125_v40, %v89_v42 }
  0x1e   :  { %v146_v49 = vadd.f32 %v134_v45, %v90_v43  ;;  %v164_v50 = vmul.f32 1.625, %v144_v41  ;;  %v143_v37 = vsel %vm142_vm3, %v140_v36, %v137_v46 }
  0x1f   :  { %v165_v52 = vmul.f32 1.625, %v145_v47  ;;  %v147_v1 = vadd.f32 %v143_v37, %v91_v31 }
  0x20   :  { %v166_v53 = vmul.f32 1.625, %v146_v49  ;;  %v172_v55 = vsub.f32 %v164_v50, %v168_v44 }
  0x21   :  { %v173_v2 = vsub.f32 %v165_v52, %v169_v48  ;;  %v167_v42 = vmul.f32 1.625, %v147_v1 }
  0x22   :  { %v174_v56 = vsub.f32 %v166_v53, %v170_v51  ;;  %v176_v43 = vsel %vm64_vm4, %v172_v55, 0.0 }
  0x23   :  { %v177_v9 = vsel %vm65_vm5, %v173_v2, 0.0  ;;  %v175_v57 = vsub.f32 %v167_v42, %v171_v54 }
  0x24   :  { %v178_v3 = vsel %vm66_vm6, %v174_v56, 0.0  ;;  %v181_v58 = vadd.f32 %v177_v9, %v176_v43 }
  0x25   :  { %v179_v4 = vsel %vm67_vm7, %v175_v57, 0.0 }
  0x26   :  { %v182_v59 = vadd.f32 %v181_v58, %v178_v3 }
  0x28   :  { %v183_v60 = vadd.f32 %v182_v59, %v179_v4 }
  0x2a   :  { %185 = vst [vmem:[%s312_s2] sm:$0xff] %v183_v60 }

</bundles_post_ra>
